<compile_context>
chip_gen: v7x
topology: tpu7x:2x2x1
jax: 0.10.0
libtpu: 0.0.40
codegen_flags: <defaults>
</compile_context>

<pallas_src>
import functools

import jax
import jax.numpy as jnp
from jax.experimental import pallas as pl
from jax.experimental.pallas import tpu as pltpu


def actor_kernel(x_ref, w1_ref, b1_ref, w2_ref, b2_ref, w3_ref, b3_ref, o_ref):
    # x_ref: (2, TB) -- batch on lanes.
    xt = x_ref[...]
    w1 = w1_ref[...]                          # (128, 2) f32

    # fc1 + relu as VPU outer-product FMAs (K=2 is far too small for the MXU):
    #   h1[f, b] = w1[f,0]*x[0,b] + w1[f,1]*x[1,b] + b1[f]
    # (broadcasts are single-use per grid step; Mosaic keeps them replicated.)
    h1 = (w1[:, 0:1] * xt[0:1, :]
          + (w1[:, 1:2] * xt[1:2, :] + b1_ref[...]))      # (128, TB) f32
    h1 = jnp.maximum(h1, 0.0)

    # fc2 + relu on the MXU with bf16 operands, f32 accumulate:
    #   (64, 128) @ (128, TB) -> (64, TB)
    h2 = jnp.dot(w2_ref[...], h1.astype(jnp.bfloat16),
                 preferred_element_type=jnp.float32) + b2_ref[...]
    h2 = jnp.maximum(h2, 0.0)

    # fc_mu + tanh: single output row -> f32 VPU multiply + sublane (XLU)
    # reduce.  (Could move to the idle MXU, but only if VALU/XLU ever binds.)
    mu = jnp.sum(w3_ref[...] * h2, axis=0, keepdims=True) + b3_ref[...]  # (1, TB)
    o_ref[...] = jnp.tanh(mu)


def _round_up(n, m):
    return ((n + m - 1) // m) * m


def _actor_forward_t(xt, params, block_b):
    """Core implementation.  xt: (2, B) f32.  Returns (1, B) f32."""
    assert block_b % 128 == 0, "block_b must be a multiple of 128 (lane width)"
    B = xt.shape[1]

    w1, b1, w2, b2, w3, b3 = (
        params["w1"], params["b1"], params["w2"],
        params["b2"], params["w3"], params["b3"],
    )
    w2_bf = w2.astype(jnp.bfloat16)   # cast once per call, not per tile

    # Batch tile selection:
    #  * tiny batches: one full block (block == full dim is always legal).
    #  * otherwise: at least 2 grid steps (v7x megacore + DMA pipelining),
    #    capped at block_b (default 8192 keeps temporaries well inside VMEM
    #    on every generation, including v7x's 64 MiB/TC).
    if B < 256:
        tb = B
    else:
        tb = min(block_b, _round_up(pl.cdiv(B, 2), 128))
    grid = (pl.cdiv(B, tb),)

    const = lambda i: (0, 0)   # weights / biases: same block every grid step

    out_t = pl.pallas_call(
        actor_kernel,
        out_shape=jax.ShapeDtypeStruct((1, B), jnp.float32),
        grid=grid,
        in_specs=[
            pl.BlockSpec((2, tb), lambda i: (0, i)),      # x^T  (batch-tiled)
            pl.BlockSpec((128, 2), const),                # w1   (out, in) f32
            pl.BlockSpec((128, 1), const),                # b1   (out, 1)
            pl.BlockSpec((64, 128), const),               # w2   bf16
            pl.BlockSpec((64, 1), const),                 # b2
            pl.BlockSpec((64, 1), const),                 # w3^T (in, 1)
            pl.BlockSpec((1, 1), const),                  # b3
        ],
        out_specs=pl.BlockSpec((1, tb), lambda i: (0, i)),
        compiler_params=pltpu.CompilerParams(
            dimension_semantics=("parallel",),            # v7x: shard over TCs
            vmem_limit_bytes=48 * 1024 * 1024,            # v5e default is 16 MiB
        ),
    )(xt, w1, b1, w2_bf, b2, w3, b3)

    return out_t                                          # (1, B)


@functools.partial(jax.jit, static_argnames=("block_b",))
def actor_forward_t(xt, params, *, block_b=8192):
    """Pre-transposed entry point: xt is (2, B), returns (1, B)."""
    return _actor_forward_t(xt, params, block_b)


@functools.partial(jax.jit, static_argnames=("block_b",))
def actor_forward(x, params, *, block_b=8192):
    """PyTorch-layout entry point: x is (B, 2), returns (B, 1).

    The single x.T below is the only extra copy on this path; callers that can
    keep observations transposed should use `actor_forward_t` and skip it.
    """
    B = x.shape[0]
    mu_t = _actor_forward_t(x.T, params, block_b)
    return mu_t.reshape(B, 1)     # (1,B) -> (B,1) is a free reshape, no copy


def init_params(key):
    """PyTorch nn.Linear-style init: uniform(-1/sqrt(fan_in), 1/sqrt(fan_in)).
    Weights kept in native (out_features, in_features) layout; biases as
    column vectors (out_features, 1); w3 stored transposed as (64, 1)."""
    def linear(k, fan_in, fan_out):
        kw, kb = jax.random.split(k)
        bound = 1.0 / jnp.sqrt(float(fan_in))
        w = jax.random.uniform(kw, (fan_out, fan_in), jnp.float32, -bound, bound)
        b = jax.random.uniform(kb, (fan_out, 1), jnp.float32, -bound, bound)
        return w, b

    k1, k2, k3 = jax.random.split(key, 3)
    w1, b1 = linear(k1, 2, 128)     # (128, 2), (128, 1)
    w2, b2 = linear(k2, 128, 64)    # (64, 128), (64, 1)
    w3, b3 = linear(k3, 64, 1)      # (1, 64),  (1, 1)
    return {"w1": w1, "b1": b1, "w2": w2, "b2": b2,
            "w3": w3.T, "b3": b3}   # w3 stored as (64, 1)


def actor_reference(x, params):
    """Plain-JAX f32 reference for correctness checking."""
    h1 = jnp.maximum(x @ params["w1"].T + params["b1"][:, 0], 0.0)
    h2 = jnp.maximum(h1 @ params["w2"].T + params["b2"][:, 0], 0.0)
    return jnp.tanh(h2 @ params["w3"] + params["b3"][:, 0])


if __name__ == "__main__":
    key = jax.random.PRNGKey(0)
    k_params, k_x1, k_x2 = jax.random.split(key, 3)

    params = init_params(k_params)

    # bf16 operands into the fc2 MXU matmul -> relax tolerance vs f32 ref.
    ATOL = RTOL = 1e-2

    # Small batch of 2-dim observations (state dim = 2 per the module).
    x_small = jax.random.normal(k_x1, (8, 2), dtype=jnp.float32)
    mu_small = jax.block_until_ready(actor_forward(x_small, params))
    ref_small = actor_reference(x_small, params)
    assert mu_small.shape == (8, 1), mu_small.shape
    assert jnp.allclose(mu_small, ref_small, atol=ATOL, rtol=RTOL), \
        "mismatch vs reference (small batch)"

    # Multi-step grid + ragged last block (no jnp.pad; padded columns masked).
    x_big = jax.random.normal(k_x2, (1000, 2), dtype=jnp.float32)
    mu_big = jax.block_until_ready(actor_forward(x_big, params, block_b=256))
    ref_big = actor_reference(x_big, params)
    assert mu_big.shape == (1000, 1), mu_big.shape
    assert jnp.allclose(mu_big, ref_big, atol=ATOL, rtol=RTOL), \
        "mismatch vs reference (tiled / ragged batch)"

    # Pre-transposed entry point (avoids the wrapper-side x.T entirely).
    mu_t = jax.block_until_ready(actor_forward_t(x_big.T, params))
    assert mu_t.shape == (1, 1000), mu_t.shape
    assert jnp.allclose(mu_t.reshape(1000, 1), ref_big, atol=ATOL, rtol=RTOL), \
        "mismatch vs reference (transposed entry point)"

    print("KERNEL_OK")
</pallas_src>

<mosaic_0001>
module attributes {stable_mosaic.version = 11 : i64} {
  func.func @actor_kernel(%arg0: i32, %arg1: memref<2x8xf32, #tpu.memory_space<vmem>>, %arg2: memref<128x2xf32, #tpu.memory_space<vmem>>, %arg3: memref<128x1xf32, #tpu.memory_space<vmem>>, %arg4: memref<64x128xbf16, #tpu.memory_space<vmem>>, %arg5: memref<64x1xf32, #tpu.memory_space<vmem>>, %arg6: memref<64x1xf32, #tpu.memory_space<vmem>>, %arg7: memref<1x1xf32, #tpu.memory_space<vmem>>, %arg8: memref<1x8xf32, #tpu.memory_space<vmem>>) attributes {dimension_semantics = [#tpu.dimension_semantics<parallel>], iteration_bounds = array<i64: 1>, scalar_prefetch = 0 : i64, scratch_operands = 0 : i64, tpu.core_type = #tpu.core_type<tc>, window_params = [{transform_indices = @transform_0, window_bounds = array<i64: 2, 8>}, {pipeline_mode = #tpu.pipeline_mode<synchronous>, transform_indices = @transform_1, window_bounds = array<i64: 128, 2>}, {pipeline_mode = #tpu.pipeline_mode<synchronous>, transform_indices = @transform_2, window_bounds = array<i64: 128, 1>}, {pipeline_mode = #tpu.pipeline_mode<synchronous>, transform_indices = @transform_3, window_bounds = array<i64: 64, 128>}, {pipeline_mode = #tpu.pipeline_mode<synchronous>, transform_indices = @transform_4, window_bounds = array<i64: 64, 1>}, {pipeline_mode = #tpu.pipeline_mode<synchronous>, transform_indices = @transform_5, window_bounds = array<i64: 64, 1>}, {pipeline_mode = #tpu.pipeline_mode<synchronous>, transform_indices = @transform_6, window_bounds = array<i64: 1, 1>}, {transform_indices = @transform_7, window_bounds = array<i64: 1, 8>}]} {
    %c0 = arith.constant 0 : index
    %c0_0 = arith.constant 0 : index
    %0 = vector.load %arg1[%c0, %c0_0] : memref<2x8xf32, #tpu.memory_space<vmem>>, vector<2x8xf32>
    %c0_1 = arith.constant 0 : index
    %c0_2 = arith.constant 0 : index
    %1 = vector.load %arg2[%c0_1, %c0_2] : memref<128x2xf32, #tpu.memory_space<vmem>>, vector<128x2xf32>
    %2 = vector.extract_strided_slice %1 {offsets = [0, 0], sizes = [128, 1], strides = [1, 1]} : vector<128x2xf32> to vector<128x1xf32>
    %3 = vector.extract_strided_slice %0 {offsets = [0, 0], sizes = [1, 8], strides = [1, 1]} : vector<2x8xf32> to vector<1x8xf32>
    %4 = vector.broadcast %2 : vector<128x1xf32> to vector<128x8xf32>
    %5 = vector.broadcast %3 : vector<1x8xf32> to vector<128x8xf32>
    %6 = arith.mulf %4, %5 : vector<128x8xf32>
    %7 = vector.extract_strided_slice %1 {offsets = [0, 1], sizes = [128, 1], strides = [1, 1]} : vector<128x2xf32> to vector<128x1xf32>
    %8 = vector.extract_strided_slice %0 {offsets = [1, 0], sizes = [1, 8], strides = [1, 1]} : vector<2x8xf32> to vector<1x8xf32>
    %9 = vector.broadcast %7 : vector<128x1xf32> to vector<128x8xf32>
    %10 = vector.broadcast %8 : vector<1x8xf32> to vector<128x8xf32>
    %11 = arith.mulf %9, %10 : vector<128x8xf32>
    %c0_3 = arith.constant 0 : index
    %c0_4 = arith.constant 0 : index
    %12 = vector.load %arg3[%c0_3, %c0_4] : memref<128x1xf32, #tpu.memory_space<vmem>>, vector<128x1xf32>
    %13 = vector.broadcast %12 : vector<128x1xf32> to vector<128x8xf32>
    %14 = arith.addf %11, %13 : vector<128x8xf32>
    %15 = arith.addf %6, %14 : vector<128x8xf32>
    %cst = arith.constant 0.000000e+00 : f32
    %16 = vector.broadcast %cst : f32 to vector<128x8xf32>
    %17 = arith.maximumf %15, %16 : vector<128x8xf32>
    %c0_5 = arith.constant 0 : index
    %c0_6 = arith.constant 0 : index
    %18 = vector.load %arg4[%c0_5, %c0_6] : memref<64x128xbf16, #tpu.memory_space<vmem>>, vector<64x128xbf16>
    %19 = arith.truncf %17 : vector<128x8xf32> to vector<128x8xbf16>
    %cst_7 = arith.constant dense<0.000000e+00> : vector<64x8xf32>
    %20 = tpu.matmul %18, %19, %cst_7 {dimension_numbers = #tpu.dot_dimension_numbers<[1], [0], [0], [1], [0, 0, 1, 1], [], []>} : vector<64x128xbf16>, vector<128x8xbf16>, vector<64x8xf32> -> vector<64x8xf32>
    %c0_8 = arith.constant 0 : index
    %c0_9 = arith.constant 0 : index
    %21 = vector.load %arg5[%c0_8, %c0_9] : memref<64x1xf32, #tpu.memory_space<vmem>>, vector<64x1xf32>
    %22 = vector.broadcast %21 : vector<64x1xf32> to vector<64x8xf32>
    %23 = arith.addf %20, %22 : vector<64x8xf32>
    %cst_10 = arith.constant 0.000000e+00 : f32
    %24 = vector.broadcast %cst_10 : f32 to vector<64x8xf32>
    %25 = arith.maximumf %23, %24 : vector<64x8xf32>
    %c0_11 = arith.constant 0 : index
    %c0_12 = arith.constant 0 : index
    %26 = vector.load %arg6[%c0_11, %c0_12] : memref<64x1xf32, #tpu.memory_space<vmem>>, vector<64x1xf32>
    %27 = vector.broadcast %26 : vector<64x1xf32> to vector<64x8xf32>
    %28 = arith.mulf %27, %25 : vector<64x8xf32>
    %cst_13 = arith.constant dense<0.000000e+00> : vector<8xf32>
    %29 = vector.multi_reduction <add>, %28, %cst_13 [0] : vector<64x8xf32> to vector<8xf32>
    %30 = vector.shape_cast %29 : vector<8xf32> to vector<1x8xf32>
    %c0_14 = arith.constant 0 : index
    %c0_15 = arith.constant 0 : index
    %31 = vector.load %arg7[%c0_14, %c0_15] : memref<1x1xf32, #tpu.memory_space<vmem>>, vector<1x1xf32>
    %32 = vector.broadcast %31 : vector<1x1xf32> to vector<1x8xf32>
    %33 = arith.addf %30, %32 : vector<1x8xf32>
    %34 = math.tanh %33 : vector<1x8xf32>
    %c0_16 = arith.constant 0 : index
    %c0_17 = arith.constant 0 : index
    %35 = vector.load %arg8[%c0_16, %c0_17] : memref<1x8xf32, #tpu.memory_space<vmem>>, vector<1x8xf32>
    tpu.vector_store %arg8[%c0_16, %c0_17], %34 {strides = array<i32>} : memref<1x8xf32, #tpu.memory_space<vmem>>, vector<1x8xf32>,
    return
  }
  func.func @transform_0(%arg0: i32) -> (i32, i32) {
    %c0_i32 = arith.constant 0 : i32
    %c0_i32_0 = arith.constant 0 : i32
    return %c0_i32, %arg0 : i32, i32
  }
  func.func @transform_1(%arg0: i32) -> (i32, i32) {
    %c0_i32 = arith.constant 0 : i32
    %c0_i32_0 = arith.constant 0 : i32
    %c0_i32_1 = arith.constant 0 : i32
    return %c0_i32, %c0_i32_0 : i32, i32
  }
  func.func @transform_2(%arg0: i32) -> (i32, i32) {
    %c0_i32 = arith.constant 0 : i32
    %c0_i32_0 = arith.constant 0 : i32
    %c0_i32_1 = arith.constant 0 : i32
    return %c0_i32, %c0_i32_0 : i32, i32
  }
  func.func @transform_3(%arg0: i32) -> (i32, i32) {
    %c0_i32 = arith.constant 0 : i32
    %c0_i32_0 = arith.constant 0 : i32
    %c0_i32_1 = arith.constant 0 : i32
    return %c0_i32, %c0_i32_0 : i32, i32
  }
  func.func @transform_4(%arg0: i32) -> (i32, i32) {
    %c0_i32 = arith.constant 0 : i32
    %c0_i32_0 = arith.constant 0 : i32
    %c0_i32_1 = arith.constant 0 : i32
    return %c0_i32, %c0_i32_0 : i32, i32
  }
  func.func @transform_5(%arg0: i32) -> (i32, i32) {
    %c0_i32 = arith.constant 0 : i32
    %c0_i32_0 = arith.constant 0 : i32
    %c0_i32_1 = arith.constant 0 : i32
    return %c0_i32, %c0_i32_0 : i32, i32
  }
  func.func @transform_6(%arg0: i32) -> (i32, i32) {
    %c0_i32 = arith.constant 0 : i32
    %c0_i32_0 = arith.constant 0 : i32
    %c0_i32_1 = arith.constant 0 : i32
    return %c0_i32, %c0_i32_0 : i32, i32
  }
  func.func @transform_7(%arg0: i32) -> (i32, i32) {
    %c0_i32 = arith.constant 0 : i32
    %c0_i32_0 = arith.constant 0 : i32
    return %c0_i32, %arg0 : i32, i32
  }
}

</mosaic_0001>

<bundles_post_ra>
// kernel: actor_forward.1
= control target key start
LH: loop header
LB: loop body
LE: loop exit
PB: predicated region body
PF: predicated region fallthrough
CT: control target
= control target key end

     0   :  { %s1061_s0 = inlined_call_operand.vmem [shape: f32[2,8], index: 0, kind: input, shape index: {}]   ;;  %s1062_s1 = inlined_call_operand.vmem [shape: f32[128,2], index: 1, kind: input, shape index: {}]   ;;  %s1063_s2 = inlined_call_operand.vmem [shape: f32[128,1], index: 2, kind: input, shape index: {}]   ;;  %s1064_s3 = inlined_call_operand.vmem [shape: bf16[64,128], index: 3, kind: input, shape index: {}]   ;;  %s1065_s4 = inlined_call_operand.vmem [shape: f32[64,1], index: 4, kind: input, shape index: {}]   ;;  %s1066_s5 = inlined_call_operand.vmem [shape: f32[64,1], index: 5, kind: input, shape index: {}]   ;;  %s1067_s6 = inlined_call_operand.<no memory space> [shape: f32[1,1], index: 6, kind: input, shape index: {}]   ;;  %s1068_s7 = inlined_call_operand.hbm [shape: f32[1,8], index: 7, kind: output, shape index: {}]  }
   0x1   :  { %v12_v0 = vstv %s1067_s6 }
   0x2   :  { %13 = vst [vmem:[#allocation2] sm:$0x1] %v12_v0 }
   0x3   :  { %v31_v1 = vld [vmem:[%s1062_s1] sm:$0xff]  ;;  %v748_v2 = vmov 1   ;;  %v749_v3 = vmov 0   ;;  %v32_v4 = vld [vmem:[%s1062_s1 + $0x8] sm:$0xff]  ;;  %v34_v6 = vld [vmem:[%s1062_s1 + $0x18] sm:$0xff] }
   0x4   :  { %701 = vset.pattern.permute.xlu0 %v748_v2  ;;  %702 = vset.pattern.permute.xlu1 %v749_v3  ;;  %v232_v5 = vld [vmem:[%s1063_s2 + $0x8] sm:$0xff]  ;;  %v33_v8 = vld [vmem:[%s1062_s1 + $0x10] sm:$0xff]  ;;  %v38_v9 = vld [vmem:[%s1062_s1 + $0x38] sm:$0xff] }
   0x5   :  { %49 = vperm.xlu1 %702, %v31_v1   ;;  %148 = vperm.xlu0 %701, %v31_v1   ;;  %v36_v7 = vld [vmem:[%s1062_s1 + $0x28] sm:$0xff] }
   0x9   :  { %54 = vperm.xlu1 %702, %v32_v4   ;;  %152 = vperm.xlu0 %701, %v32_v4  }
   0xd   :  { %254 = vperm.xlu1 %702, %v232_v5   ;;  %160 = vperm.xlu0 %701, %v34_v6  }
  0x11   :  { %703 = vset.pattern.permute.xlu1 %v748_v2  ;;  %168 = vperm.xlu0 %701, %v36_v7  }
  0x12   :  { %156 = vperm.xlu1 %703, %v33_v8  }
  0x13   :  { %14 = vsyncpa [#allocation4], 0  ;;  %v40_v10 = vld [vmem:[%s1062_s1 + $0x48] sm:$0xff]  ;;  %v825_v11 = vld [vmem:[%s1062_s1 + $0x58] sm:$0xff]  ;;  %v127_v53 = vlaneseq  ;;  %vm592_vm0 = vcmask 64512   ;;  %vm626_vm1 = vcmask 57344  }
  0x14   :  { %v234_v12 = vld [vmem:[%s1063_s2 + $0x18] sm:$0xff]  ;;  %v834_v13 = vld [vmem:[%s1062_s1 + $0x68] sm:$0xff]  ;;  %v35_v14 = vld [vmem:[%s1062_s1 + $0x20] sm:$0xff] }
  0x15   :  { %176 = vperm.xlu0 %701, %v38_v9   ;;  %v843_v15 = vld [vmem:[%s1062_s1 + $0x78] sm:$0xff]  ;;  %v231_v16 = vld [vmem:[%s1063_s2] sm:$0xff]  ;;  %v233_v17 = vld [vmem:[%s1063_s2 + $0x10] sm:$0xff]  ;;  %v960_v59 = vshrl.u32 %v127_v53, 7 }
  0x16   :  { %704 = vset.pattern.permute.xlu1 %v749_v3  ;;  %v236_v18 = vld [vmem:[%s1063_s2 + $0x28] sm:$0xff]  ;;  %v235_v19 = vld [vmem:[%s1063_s2 + $0x20] sm:$0xff]  ;;  %v37_v20 = vld [vmem:[%s1062_s1 + $0x30] sm:$0xff] }
  0x17   :  { %59 = vperm.xlu1 %704, %v33_v8   ;;  %v237_v21 = vld [vmem:[%s1063_s2 + $0x30] sm:$0xff]  ;;  %v239_v22 = vld [vmem:[%s1063_s2 + $0x40] sm:$0xff]  ;;  %v238_v25 = vld [vmem:[%s1063_s2 + $0x38] sm:$0xff]  ;;  %v213_v62 = vsub.s32 1, %v960_v59 }
  0x18   :  { %v241_v23 = vld [vmem:[%s1063_s2 + $0x50] sm:$0xff]  ;;  %v243_v24 = vld [vmem:[%s1063_s2 + $0x60] sm:$0xff]  ;;  %v392_v28 = vld [vmem:[%s1065_s4 + $0x8] sm:$0xff] }
  0x19   :  { %184 = vperm.xlu0 %701, %v40_v10   ;;  %v245_v26 = vld [vmem:[%s1063_s2 + $0x70] sm:$0xff]  ;;  %v39_v27 = vld [vmem:[%s1062_s1 + $0x40] sm:$0xff]  ;;  %v394_v29 = vld [vmem:[%s1065_s4 + $0x18] sm:$0xff] }
  0x1a   :  { %v537_v30 = vld [vmem:[%s1066_s5 + $0x8] sm:$0xff]  ;;  %v538_v32 = vld [vmem:[%s1066_s5 + $0x10] sm:$0xff]  ;;  %v539_v34 = vld [vmem:[%s1066_s5 + $0x18] sm:$0xff] }
  0x1b   :  { %64 = vperm.xlu1 %704, %v34_v6   ;;  %v240_v31 = vld [vmem:[%s1063_s2 + $0x48] sm:$0xff]  ;;  %v41_v33 = vld [vmem:[%s1062_s1 + $0x50] sm:$0xff]  ;;  %v540_v35 = vld [vmem:[%s1066_s5 + $0x20] sm:$0xff] }
  0x1c   :  { %v541_v36 = vld [vmem:[%s1066_s5 + $0x28] sm:$0xff]  ;;  %v543_v37 = vld [vmem:[%s1066_s5 + $0x38] sm:$0xff]  ;;  %v43_v39 = vld [vmem:[%s1062_s1 + $0x60] sm:$0xff] }
  0x1d   :  { %192 = vperm.xlu0 %701, %v825_v11   ;;  %v242_v38 = vld [vmem:[%s1063_s2 + $0x58] sm:$0xff]  ;;  %v244_v40 = vld [vmem:[%s1063_s2 + $0x68] sm:$0xff]  ;;  %v45_v41 = vld [vmem:[%s1062_s1 + $0x70] sm:$0xff] }
  0x1e   :  { %v246_v46 = vld [vmem:[%s1063_s2 + $0x78] sm:$0xff]  ;;  %v391_v49 = vld [vmem:[%s1065_s4] sm:$0xff]  ;;  %v393_v51 = vld [vmem:[%s1065_s4 + $0x10] sm:$0xff] }
  0x1f   :  { %264 = vperm.xlu1 %704, %v234_v12   ;;  %v536_v55 = vld [vmem:[%s1066_s5] sm:$0xff]  ;;  %v719_v57 = vld [vmem:[%s1064_s3 + $0x10] sm:$0xff]  }
  0x20   :  { %v718_v56 = vld [vmem:[%s1064_s3] sm:$0xff]   ;;  %678 = vmatprep.mubr.bf16.mxu1 %v719_v57  ;;  %v397_v6 = vld [vmem:[%s1065_s4 + $0x30] sm:$0xff] }
  0x21   :  { %200 = vperm.xlu0 %701, %v834_v13   ;;  %674 = vmatprep.mubr.bf16.mxu0 %v718_v56  ;;  %v395_v61 = vld [vmem:[%s1065_s4 + $0x20] sm:$0xff] }
  0x22   :  { %v30_v0 = vld [vmem:[%s1061_s0] sm:$0x3] }
  0x23   :  { %705 = vset.pattern.permute.xlu1 %v748_v2 }
  0x24   :  { %164 = vperm.xlu1 %705, %v35_v14  }
  0x25   :  { %208 = vperm.xlu0 %701, %v843_v15  }
  0x28   :  { %706 = vset.pattern.permute.xlu1 %v749_v3 }
  0x29   :  { %69 = vperm.xlu1 %706, %v35_v14   ;;  %716 = vset.pattern.permute.xlu0 %v749_v3 }
  0x2a   :  { %249 = vperm.xlu0 %716, %v231_v16  }
  0x2d   :  { %74 = vperm.xlu1 %706, %v36_v7   ;;  %v129_v7 = vsub.s32 0, %v960_v59 }
  0x2e   :  { %259 = vperm.xlu0 %716, %v233_v17  }
  0x2f   :  { %v992_v12 = vrot.slane %v30_v0, %v129_v7 }
  0x31   :  { %274 = vperm.xlu1 %706, %v236_v18   ;;  %v542_v18 = vld [vmem:[%s1066_s5 + $0x30] sm:$0xff] }
  0x32   :  { %269 = vperm.xlu0 %716, %v235_v19  }
  0x35   :  { %707 = vset.pattern.permute.xlu1 %v748_v2 }
  0x36   :  { %172 = vperm.xlu1 %707, %v37_v20   ;;  %279 = vperm.xlu0 %716, %v237_v21  }
  0x3a   :  { %708 = vset.pattern.permute.xlu1 %v749_v3  ;;  %289 = vperm.xlu0 %716, %v239_v22  }
  0x3b   :  { %79 = vperm.xlu1 %708, %v37_v20  }
  0x3e   :  { %299 = vperm.xlu0 %716, %v241_v23  }
  0x3f   :  { %84 = vperm.xlu1 %708, %v38_v9  }
  0x42   :  { %309 = vperm.xlu0 %716, %v243_v24  }
  0x43   :  { %284 = vperm.xlu1 %708, %v238_v25  }
  0x46   :  { %319 = vperm.xlu0 %716, %v245_v26  }
  0x47   :  { %709 = vset.pattern.permute.xlu1 %v748_v2 }
  0x48   :  { %180 = vperm.xlu1 %709, %v39_v27  }
  0x4a   :  { %406 = vperm.xlu0 %716, %v392_v28   ;;  %v614_v28 = vld [vmem:[#allocation2] sm:$0x1] }
  0x4c   :  { %710 = vset.pattern.permute.xlu1 %v749_v3 }
  0x4d   :  { %89 = vperm.xlu1 %710, %v39_v27  }
  0x4e   :  { %416 = vperm.xlu0 %716, %v394_v29  }
  0x51   :  { %94 = vperm.xlu1 %710, %v40_v10  }
  0x52   :  { %551 = vperm.xlu0 %716, %v537_v30  }
  0x55   :  { %294 = vperm.xlu1 %710, %v240_v31  }
  0x56   :  { %556 = vperm.xlu0 %716, %v538_v32  }
  0x59   :  { %711 = vset.pattern.permute.xlu1 %v748_v2 }
  0x5a   :  { %188 = vperm.xlu1 %711, %v41_v33   ;;  %561 = vperm.xlu0 %716, %v539_v34  }
  0x5e   :  { %712 = vset.pattern.permute.xlu1 %v749_v3  ;;  %566 = vperm.xlu0 %716, %v540_v35  }
  0x5f   :  { %99 = vperm.xlu1 %712, %v41_v33  }
  0x62   :  { %571 = vperm.xlu0 %716, %v541_v36  }
  0x63   :  { %104 = vperm.xlu1 %712, %v825_v11   ;;  %v398_v11 = vld [vmem:[%s1065_s4 + $0x38] sm:$0xff] }
  0x66   :  { %581 = vperm.xlu0 %716, %v543_v37  }
  0x67   :  { %304 = vperm.xlu1 %712, %v242_v38  }
  0x6b   :  { %713 = vset.pattern.permute.xlu1 %v748_v2 }
  0x6c   :  { %196 = vperm.xlu1 %713, %v43_v39  }
  0x70   :  { %714 = vset.pattern.permute.xlu1 %v749_v3 }
  0x71   :  { %109 = vperm.xlu1 %714, %v43_v39  }
  0x75   :  { %114 = vperm.xlu1 %714, %v834_v13  }
  0x79   :  { %314 = vperm.xlu1 %714, %v244_v40  }
  0x7d   :  { %715 = vset.pattern.permute.xlu1 %v748_v2  ;;  %v396_v2 = vld [vmem:[%s1065_s4 + $0x28] sm:$0xff] }
  0x7e   :  { %204 = vperm.xlu1 %715, %v45_v41  }
  0x82   :  { %717 = vset.pattern.permute.xlu1 %v749_v3  ;;  %v976_v3 = vrot.slane %v30_v0, %v213_v62 }
  0x83   :  { %119 = vperm.xlu1 %717, %v45_v41  }
  0x84   :  { %v50_v42 = vpop.permute.xlu1 %49  ;;  %v149_v43 = vpop.permute.xlu0 %148 }
  0x85   :  { %v215_v14 = vmul.f32 %v976_v3, %v149_v43  ;;  %v131_v21 = vmul.f32 %v992_v12, %v50_v42 }
  0x87   :  { %124 = vperm.xlu1 %717, %v843_v15  }
  0x88   :  { %v55_v44 = vpop.permute.xlu1 %54  ;;  %v153_v45 = vpop.permute.xlu0 %152 }
  0x89   :  { %v216_v8 = vmul.f32 %v976_v3, %v153_v45  ;;  %v132_v16 = vmul.f32 %v992_v12, %v55_v44 }
  0x8b   :  { %324 = vperm.xlu1 %717, %v246_v46  }
  0x8c   :  { %v255_v47 = vpop.permute.xlu1 %254  ;;  %v161_v48 = vpop.permute.xlu0 %160 }
  0x8d   :  { %v328_v13 = vadd.f32 %v255_v47, %v216_v8  ;;  %v218_v15 = vmul.f32 %v976_v3, %v161_v48 }
  0x8f   :  { %401 = vperm.xlu1 %717, %v391_v49   ;;  %v344_v19 = vadd.f32 %v328_v13, %v132_v16 }
  0x90   :  { %v169_v50 = vpop.permute.xlu0 %168 }
  0x91   :  { %v157_v52 = vpop.permute.xlu1 %156  ;;  %v360_v29 = vmax.f32 %v344_v19, 0.0  ;;  %v220_v30 = vmul.f32 %v976_v3, %v169_v50 }
  0x92   :  { %v217_v24 = vmul.f32 %v976_v3, %v157_v52 }
  0x93   :  { %411 = vperm.xlu1 %717, %v393_v51  }
  0x94   :  { %v949_v54 = vpop.permute.xlu0 %176 }
  0x96   :  { %v60_v58 = vpop.permute.xlu1 %59 }
  0x97   :  { %546 = vperm.xlu1 %717, %v536_v55   ;;  %v133_v32 = vmul.f32 %v992_v12, %v60_v58 }
  0x98   :  { %v962_v60 = vpop.permute.xlu0 %184 }
  0x99   :  { %v224_v19 = vmul.f32 %v976_v3, %v962_v60 }
  0x9a   :  { %v65_v63 = vpop.permute.xlu1 %64 }
  0x9b   :  { %421 = vperm.xlu1 %717, %v395_v61   ;;  %v134_v25 = vmul.f32 %v992_v12, %v65_v63  ;;  %v222_v61 = vmul.f32 %v976_v3, %v949_v54 }
  0x9c   :  { %v971_v1 = vpop.permute.xlu0 %192 }
  0x9e   :  { %v265_v4 = vpop.permute.xlu1 %264 }
  0x9f   :  { %426 = vperm.xlu1 %717, %v396_v2   ;;  %v330_v22 = vadd.f32 %v265_v4, %v218_v15 }
  0xa0   :  { %v978_v5 = vpop.permute.xlu0 %200 }
  0xa1   :  { %v346_v33 = vadd.f32 %v330_v22, %v134_v25 }
  0xa3   :  { %431 = vperm.xlu1 %717, %v397_v6   ;;  %v165_v9 = vpop.permute.xlu1 %164  ;;  %v362_v43 = vmax.f32 %v346_v33, 0.0 }
  0xa4   :  { %v985_v10 = vpop.permute.xlu0 %208  ;;  %v219_v36 = vmul.f32 %v976_v3, %v165_v9 }
  0xa7   :  { %436 = vperm.xlu1 %717, %v398_v11  }
  0xa8   :  { %v70_v17 = vpop.permute.xlu1 %69 }
  0xa9   :  { %v250_v20 = vpop.permute.xlu0 %249  ;;  %v135_v44 = vmul.f32 %v992_v12, %v70_v17 }
  0xaa   :  { %v327_v23 = vadd.f32 %v250_v20, %v215_v14 }
  0xab   :  { %576 = vperm.xlu1 %717, %v542_v18  }
  0xac   :  { %v343_v26 = vadd.f32 %v327_v23, %v131_v21  ;;  %v75_v27 = vpop.permute.xlu1 %74 }
  0xad   :  { %v260_v31 = vpop.permute.xlu0 %259  ;;  %v136_v40 = vmul.f32 %v992_v12, %v75_v27 }
  0xae   :  { %v359_v34 = vmax.f32 %v343_v26, 0.0  ;;  %v329_v35 = vadd.f32 %v260_v31, %v217_v24 }
  0xaf   :  { %617 = vperm.xlu1 %717, %v614_v28  }
  0xb0   :  { %v383_v37 = vpack.c.bf16 %v360_v29, %v359_v34  ;;  %v345_v38 = vadd.f32 %v329_v35, %v133_v32  ;;  %v275_v39 = vpop.permute.xlu1 %274  ;;  %v226_v34 = vmul.f32 %v976_v3, %v971_v1 }
  0xb1   :  { %v332_v41 = vadd.f32 %v275_v39, %v220_v30  ;;  %v270_v42 = vpop.permute.xlu0 %269 }
  0xb2   :  { %v361_v45 = vmax.f32 %v345_v38, 0.0  ;;  %v331_v46 = vadd.f32 %v270_v42, %v219_v36  ;;  %658 = vmatprep.subr.bf16.mxu0 %v383_v37  ;;  %682 = vmatprep.subr.bf16.mxu1 %v383_v37 }
  0xb3   :  { %v348_v47 = vadd.f32 %v332_v41, %v136_v40  ;;  %659 = vmatpush3.bf16.msra.mxu0 %v383_v37  ;;  %690 = vmatpush3.bf16.msra.mxu1 %v383_v37 }
  0xb4   :  { %v384_v48 = vpack.c.bf16 %v362_v43, %v361_v45  ;;  %v347_v49 = vadd.f32 %v331_v46, %v135_v44 }
  0xb5   :  { %v364_v50 = vmax.f32 %v348_v47, 0.0  ;;  %v173_v51 = vpop.permute.xlu1 %172  ;;  %v280_v57 = vpop.permute.xlu0 %279 }
  0xb6   :  { %v363_v52 = vmax.f32 %v347_v49, 0.0  ;;  %660 = vmatprep.subr.bf16.mxu0 %v384_v48  ;;  %683 = vmatprep.subr.bf16.mxu1 %v384_v48  ;;  %v221_v56 = vmul.f32 %v976_v3, %v173_v51  ;;  %v228_v49 = vmul.f32 %v976_v3, %v978_v5 }
  0xb7   :  { %661 = vmatpush3.bf16.msra.mxu0 %v384_v48  ;;  %691 = vmatpush3.bf16.msra.mxu1 %v384_v48 }
  0xb8   :  { %v385_v53 = vpack.c.bf16 %v364_v50, %v363_v52  ;;  %v333_v63 = vadd.f32 %v280_v57, %v221_v56 }
  0xb9   :  { %v290_v18 = vpop.permute.xlu0 %289 }
  0xba   :  { %v80_v55 = vpop.permute.xlu1 %79  ;;  %662 = vmatprep.subr.bf16.mxu0 %v385_v53  ;;  %684 = vmatprep.subr.bf16.mxu1 %v385_v53 }
  0xbb   :  { %663 = vmatpush3.bf16.msra.mxu0 %v385_v53  ;;  %692 = vmatpush3.bf16.msra.mxu1 %v385_v53  ;;  %v137_v62 = vmul.f32 %v992_v12, %v80_v55 }
  0xbd   :  { %v349_v2 = vadd.f32 %v333_v63, %v137_v62  ;;  %v300_v33 = vpop.permute.xlu0 %299 }
  0xbe   :  { %v85_v58 = vpop.permute.xlu1 %84 }
  0xbf   :  { %v138_v4 = vmul.f32 %v992_v12, %v85_v58  ;;  %v365_v9 = vmax.f32 %v349_v2, 0.0 }
  0xc1   :  { %v310_v48 = vpop.permute.xlu0 %309 }
  0xc2   :  { %v285_v0 = vpop.permute.xlu1 %284 }
  0xc3   :  { %v334_v6 = vadd.f32 %v285_v0, %v222_v61 }
  0xc5   :  { %v350_v8 = vadd.f32 %v334_v6, %v138_v4  ;;  %v320_v4 = vpop.permute.xlu0 %319  ;;  %v230_v6 = vmul.f32 %v976_v3, %v985_v10 }
  0xc7   :  { %v366_v11 = vmax.f32 %v350_v8, 0.0  ;;  %v181_v13 = vpop.permute.xlu1 %180 }
  0xc8   :  { %v223_v54 = vmul.f32 %v976_v3, %v181_v13 }
  0xc9   :  { %v386_v14 = vpack.c.bf16 %v366_v11, %v365_v9 }
  0xca   :  { %v335_v20 = vadd.f32 %v290_v18, %v223_v54  ;;  %v720_v18 = vld [vmem:[%s1064_s3 + $0x8] sm:$0xff]  }
  0xcb   :  { %664 = vmatprep.subr.bf16.mxu0 %v386_v14  ;;  %685 = vmatprep.subr.bf16.mxu1 %v386_v14 }
  0xcc   :  { %v90_v15 = vpop.permute.xlu1 %89  ;;  %665 = vmatpush3.bf16.msra.mxu0 %v386_v14  ;;  %693 = vmatpush3.bf16.msra.mxu1 %v386_v14 }
  0xcd   :  { %v139_v17 = vmul.f32 %v992_v12, %v90_v15 }
  0xcf   :  { %v351_v22 = vadd.f32 %v335_v20, %v139_v17 }
  0xd0   :  { %v95_v16 = vpop.permute.xlu1 %94 }
  0xd1   :  { %v140_v23 = vmul.f32 %v992_v12, %v95_v16  ;;  %v367_v26 = vmax.f32 %v351_v22, 0.0 }
  0xd4   :  { %v295_v21 = vpop.permute.xlu1 %294 }
  0xd5   :  { %v336_v24 = vadd.f32 %v295_v21, %v224_v19 }
  0xd7   :  { %v352_v25 = vadd.f32 %v336_v24, %v140_v23 }
  0xd9   :  { %v368_v27 = vmax.f32 %v352_v25, 0.0  ;;  %v189_v28 = vpop.permute.xlu1 %188 }
  0xda   :  { %v225_v31 = vmul.f32 %v976_v3, %v189_v28 }
  0xdb   :  { %v387_v29 = vpack.c.bf16 %v368_v27, %v367_v26 }
  0xdc   :  { %v337_v35 = vadd.f32 %v300_v33, %v225_v31 }
  0xdd   :  { %666 = vmatprep.subr.bf16.mxu0 %v387_v29  ;;  %686 = vmatprep.subr.bf16.mxu1 %v387_v29 }
  0xde   :  { %v100_v30 = vpop.permute.xlu1 %99  ;;  %667 = vmatpush3.bf16.msra.mxu0 %v387_v29  ;;  %694 = vmatpush3.bf16.msra.mxu1 %v387_v29 }
  0xdf   :  { %v141_v60 = vmul.f32 %v992_v12, %v100_v30 }
  0xe1   :  { %v353_v37 = vadd.f32 %v337_v35, %v141_v60 }
  0xe2   :  { %v105_v32 = vpop.permute.xlu1 %104 }
  0xe3   :  { %v142_v38 = vmul.f32 %v992_v12, %v105_v32  ;;  %v369_v41 = vmax.f32 %v353_v37, 0.0 }
  0xe6   :  { %v305_v36 = vpop.permute.xlu1 %304 }
  0xe7   :  { %v338_v39 = vadd.f32 %v305_v36, %v226_v34 }
  0xe9   :  { %v354_v40 = vadd.f32 %v338_v39, %v142_v38 }
  0xeb   :  { %v370_v42 = vmax.f32 %v354_v40, 0.0  ;;  %v197_v43 = vpop.permute.xlu1 %196 }
  0xec   :  { %v227_v46 = vmul.f32 %v976_v3, %v197_v43 }
  0xed   :  { %v388_v44 = vpack.c.bf16 %v370_v42, %v369_v41 }
  0xee   :  { %v339_v50 = vadd.f32 %v310_v48, %v227_v46 }
  0xef   :  { %668 = vmatprep.subr.bf16.mxu0 %v388_v44  ;;  %687 = vmatprep.subr.bf16.mxu1 %v388_v44 }
  0xf0   :  { %v110_v45 = vpop.permute.xlu1 %109  ;;  %669 = vmatpush3.bf16.msra.mxu0 %v388_v44  ;;  %695 = vmatpush3.bf16.msra.mxu1 %v388_v44 }
  0xf1   :  { %v143_v1 = vmul.f32 %v992_v12, %v110_v45 }
  0xf3   :  { %v355_v52 = vadd.f32 %v339_v50, %v143_v1 }
  0xf4   :  { %v115_v47 = vpop.permute.xlu1 %114 }
  0xf5   :  { %v144_v53 = vmul.f32 %v992_v12, %v115_v47  ;;  %v371_v57 = vmax.f32 %v355_v52, 0.0 }
  0xf8   :  { %v315_v51 = vpop.permute.xlu1 %314 }
  0xf9   :  { %v340_v55 = vadd.f32 %v315_v51, %v228_v49 }
  0xfb   :  { %v356_v56 = vadd.f32 %v340_v55, %v144_v53 }
  0xfd   :  { %v372_v58 = vmax.f32 %v356_v56, 0.0  ;;  %v205_v61 = vpop.permute.xlu1 %204 }
  0xfe   :  { %v229_v0 = vmul.f32 %v976_v3, %v205_v61  ;;  %v721_v3 = vld [vmem:[%s1064_s3 + $0x18] sm:$0xff]   ;;  %s750_s3 = smov [#allocation3]  }
  0xff   :  { %v389_v62 = vpack.c.bf16 %v372_v58, %v371_v57  ;;  %s634_s30 = sshll.u32 %s750_s3, 4  ;;  %s635_s30 = int_to_ptr.vmem [resolvable:$true] %s634_s30 }
 0x100   :  { %v341_v8 = vadd.f32 %v320_v4, %v229_v0  ;;  %s724_s8 = scalar_lea.vmem %s635_s30, 16  ;;  %s728_s9 = scalar_lea.vmem %s635_s30, 32 }
 0x101   :  { %670 = vmatprep.subr.bf16.mxu0 %v389_v62  ;;  %688 = vmatprep.subr.bf16.mxu1 %v389_v62  ;;  %p725_p0 = scmp.ne.s32.totalorder %s635_s30, %s724_s8  ;;  %p729_p1 = scmp.lt.s32.totalorder %s635_s30, %s635_s30 }
 0x102   :  { %v120_v63 = vpop.permute.xlu1 %119  ;;  %671 = vmatpush3.bf16.msra.mxu0 %v389_v62  ;;  %696 = vmatpush3.bf16.msra.mxu1 %v389_v62  ;;  %p730_p2 = scmp.lt.s32.totalorder %s728_s9, %s724_s8 }
 0x103   :  { %v145_v5 = vmul.f32 %v992_v12, %v120_v63 }
 0x104   :  { %p731_p3 = por %p730_p2, %p729_p1 }
 0x105   :  { %v357_v11 = vadd.f32 %v341_v8, %v145_v5 }
 0x106   :  { %v125_v2 = vpop.permute.xlu1 %124  ;;  %p732_p4 = pnand %p731_p3, %p725_p0 }
 0x107   :  { %v146_v13 = vmul.f32 %v992_v12, %v125_v2  ;;  %v373_v54 = vmax.f32 %v357_v11, 0.0  ;;  %v407_v12 = vpop.permute.xlu0 %406 }
 0x10a   :  { %v325_v9 = vpop.permute.xlu1 %324 }
 0x10b   :  { %v342_v14 = vadd.f32 %v325_v9, %v230_v6  ;;  %v417_v20 = vpop.permute.xlu0 %416 }
 0x10d   :  { %v358_v15 = vadd.f32 %v342_v14, %v146_v13 }
 0x10e   :  { %v402_v10 = vpop.permute.xlu1 %401 }
 0x10f   :  { %v374_v16 = vmax.f32 %v358_v15, 0.0  ;;  %v552_v22 = vpop.permute.xlu0 %551 }
 0x111   :  { %v390_v17 = vpack.c.bf16 %v374_v16, %v373_v54 }
 0x112   :  { %v412_v19 = vpop.permute.xlu1 %411 }
 0x113   :  { %672 = vmatprep.subr.bf16.mxu0 %v390_v17  ;;  %689 = vmatprep.subr.bf16.mxu1 %v390_v17  ;;  %v557_v24 = vpop.permute.xlu0 %556 }
 0x114   :  { %673 = vmatpush3.bf16.msra.mxu0 %v390_v17  ;;  %697 = vmatpush3.bf16.msra.mxu1 %v390_v17 }
 0x116   :  { %v547_v21 = vpop.permute.xlu1 %546 }
 0x117   :  { %675 = vmatmul.mubr.bf16.vlgmr.msra.gmra.mrb[0].mxu0 %v720_v18  ;;  %679 = vmatmul.mubr.bf16.vlgmr.msra.gmra.mrb[0].mxu1 %v721_v3  ;;  %v562_v26 = vpop.permute.xlu0 %561 }
 0x11a   :  { %v422_v23 = vpop.permute.xlu1 %421 }
 0x11b   :  { %v567_v42 = vpop.permute.xlu0 %566 }
 0x11e   :  { %v427_v25 = vpop.permute.xlu1 %426 }
 0x11f   :  { %v572_v57 = vpop.permute.xlu0 %571 }
 0x122   :  { %v432_v27 = vpop.permute.xlu1 %431 }
 0x123   :  { %v582_v13 = vpop.permute.xlu0 %581 }
 0x126   :  { %v437_v47 = vpop.permute.xlu1 %436 }
 0x12a   :  { %v577_v6 = vpop.permute.xlu1 %576 }
 0x1ea   :  { %v676_v28 = vpop.f32.mrb[0].mxu0  ;;  %v680_v29 = vpop.f32.mrb[0].mxu1 }
 0x1eb   :  { %v506_v30 = vadd.f32 %v676_v28, %v412_v19  ;;  %v497_v31 = vpop.f32.mrb[1].mxu0  ;;  %v513_v32 = vpop.f32.mrb[1].mxu1  ;;  %v522_v48 = vadd.f32 %v680_v29, %v432_v27 }
 0x1ec   :  { %v498_v60 = vadd.f32 %v497_v31, %v402_v10  ;;  %v677_v33 = vpop.f32.mrb[2].mxu0  ;;  %v681_v34 = vpop.f32.mrb[2].mxu1  ;;  %v514_v40 = vadd.f32 %v513_v32, %v422_v23 }
 0x1ed   :  { %v509_v35 = vadd.f32 %v677_v33, %v417_v20  ;;  %v500_v36 = vpop.f32.mrb[3].mxu0  ;;  %v516_v37 = vpop.f32.mrb[3].mxu1  ;;  %v530_v38 = vmax.f32 %v506_v30, 0.0  ;;  %v525_v51 = vadd.f32 %v681_v34, %v437_v47  ;;  %v534_v62 = vmax.f32 %v522_v48, 0.0 }
 0x1ee   :  { %v528_v39 = vmax.f32 %v498_v60, 0.0  ;;  %v501_v41 = vadd.f32 %v500_v36, %v407_v12  ;;  %v517_v46 = vadd.f32 %v516_v37, %v427_v25  ;;  %v532_v49 = vmax.f32 %v514_v40, 0.0 }
 0x1ef   :  { %v531_v44 = vmax.f32 %v509_v35, 0.0  ;;  %v586_v1 = vmul.f32 %v557_v24, %v530_v38  ;;  %v535_v5 = vmax.f32 %v525_v51, 0.0  ;;  %v590_v9 = vmul.f32 %v577_v6, %v534_v62 }
 0x1f0   :  { %v584_v43 = vmul.f32 %v547_v21, %v528_v39  ;;  %v529_v45 = vmax.f32 %v501_v41, 0.0  ;;  %v533_v56 = vmax.f32 %v517_v46, 0.0  ;;  %v588_v63 = vmul.f32 %v567_v42, %v532_v49 }
 0x1f1   :  { %v587_v53 = vmul.f32 %v562_v26, %v531_v44  ;;  %v596_v61 = vsel %vm592_vm0, %v586_v1, 0.0  ;;  %v591_v15 = vmul.f32 %v582_v13, %v535_v5  ;;  %v604_v17 = vsel %vm592_vm0, %v590_v9, 0.0 }
 0x1f2   :  { %v585_v50 = vmul.f32 %v552_v22, %v529_v45  ;;  %v593_v52 = vsel %vm592_vm0, %v584_v43, 0.0  ;;  %v589_v4 = vmul.f32 %v572_v57, %v533_v56  ;;  %v600_v11 = vsel %vm592_vm0, %v588_v63, 0.0  ;;  %v618_v22 = vpop.permute.xlu1 %617 }
 0x1f3   :  { %v598_v2 = vsel %vm592_vm0, %v587_v53, 0.0  ;;  %v606_v3 = vsel %vm592_vm0, %v591_v15, 0.0  ;;  %v623_v24 = vrot.slane %v618_v22, %v129_v7 }
 0x1f4   :  { %v594_v55 = vsel %vm592_vm0, %v585_v50, 0.0  ;;  %v602_v54 = vsel %vm592_vm0, %v589_v4, 0.0 }
 0x1f5   :  { %v595_v58 = vadd.f32 %v594_v55, %v593_v52 }
 0x1f7   :  { %v597_v0 = vadd.f32 %v596_v61, %v595_v58 }
 0x1f9   :  { %v599_v8 = vadd.f32 %v598_v2, %v597_v0 }
 0x1fb   :  { %v601_v14 = vadd.f32 %v600_v11, %v599_v8 }
 0x1fd   :  { %v603_v16 = vadd.f32 %v602_v54, %v601_v14 }
 0x1ff   :  { %v605_v18 = vadd.f32 %v604_v17, %v603_v16 }
 0x201   :  { %v607_v10 = vadd.f32 %v606_v3, %v605_v18 }
 0x203   :  { %v608_v12 = vrot.slane %v607_v10, 4 }
 0x205   :  { %v609_v19 = vadd.f32 %v608_v12, %v607_v10 }
 0x207   :  { %v610_v20 = vrot.slane %v609_v19, 2 }
 0x209   :  { %v611_v21 = vadd.f32 %v610_v20, %v609_v19 }
 0x20b   :  { %v612_v23 = vrot.slane %v611_v21, 1 }
 0x20d   :  { %v613_v25 = vadd.f32 %v612_v23, %v611_v21 }
 0x20f   :  { %v624_v26 = vadd.f32 %v623_v24, %v613_v25 }
 0x211   :  { %722 = vtanh.f32 %v624_v26 }
 0x21b   :  { %v723_v27 = vpop.eup %722 }
 0x21c   :  { %627 = vst.msk [vmem:[#allocation3] sm:$0x1] %vm626_vm1, %v723_v27 }
 0x21d   :  { %735 = shalt.err (!%p732_p4)
}
 0x21e   :  { %s736_s11 = scalar_lea.hbm %s1068_s7, 16 }
 0x21f   :  { %p737_p5 = scmp.ne.s32.totalorder %s1068_s7, %s736_s11  ;;  %p740_p6 = scmp.lt.u32.totalorder %s736_s11, %s1068_s7 }
 0x221   :  { %p742_p7 = pnand %p740_p6, %p737_p5 }
 0x223   :  { %745 = shalt.err (!%p742_p7)
}
 0x224   :  { %637 = dma.vmem_to_hbm [thread:$0]  %s635_s30, 16, %s1068_s7, [#allocation4]  }
 0x225   :  { %746 = dma.done.wait [#allocation4], 16  }
 0x226   :  { %747 = vsyncadd [#allocation4], 4294967280 }
 0x227   :  { %641 = vsyncpa [#allocation4], 1 }

</bundles_post_ra>
